<compile_context>
chip_gen: v6e
topology: v6e:2x2x1
jax: 0.10.0
libtpu: 0.0.40
codegen_flags: <defaults>
</compile_context>

<pallas_src>
import math
import functools

import jax
import jax.numpy as jnp
from jax.experimental import pallas as pl
from jax.experimental.pallas import tpu as pltpu


# Vocab size above which the one-hot MXU gather (O(T*V*D) flops) is replaced by
# a real gather on the VMEM-resident table.
_ONE_HOT_MAX_VOCAB = 2048


def _sublane_multiple(dtype):
    # f32/i32 -> 8 sublanes per vreg; bf16 -> 16; int8/fp8 -> 32.
    return max(8, 32 // jnp.dtype(dtype).itemsize)


def _embed_kernel(ids_ref, emb_ref, out_ref, *, scale, vocab_size, use_one_hot):
    # ids_ref: (T, 1) int32 token ids (sublane-major: no lane->sublane relayout)
    # emb_ref: (V, D) embedding table, VMEM-resident (block index constant)
    # out_ref: (T, D) lane/sublane-dense output slab
    ids = ids_ref[...]                                            # (T, 1) int32
    if use_one_hot:
        T = ids.shape[0]
        col = jax.lax.broadcasted_iota(jnp.int32, (T, vocab_size), 1)
        # (T,1) == (T,V): cheap lane broadcast. Exact {0,1} one-hot keeps the
        # MXU gather bit-exact; the scale stays a separate f32 VPU multiply.
        one_hot = (ids == col).astype(emb_ref.dtype)
        gathered = jnp.dot(one_hot, emb_ref[...],
                           preferred_element_type=jnp.float32)
    else:
        # Real gather for medium vocabularies: O(T*D) instead of O(T*V*D).
        gathered = jnp.take(emb_ref[...], ids[:, 0], axis=0).astype(jnp.float32)
    out_ref[...] = (gathered * scale).astype(out_ref.dtype)


def _choose_block_tokens(n_tokens, sub, block_tokens):
    """Pick token block size T (multiple of `sub`); prefer a T that divides
    n_tokens so neither padding nor a post-kernel slice copy is needed."""
    if n_tokens <= block_tokens:
        t = -(-n_tokens // sub) * sub
        return t, t != n_tokens
    cap = block_tokens - (block_tokens % sub)
    min_good = max(sub, min(cap, 256))           # don't accept tiny divisors
    for t in range(cap, min_good - 1, -sub):
        if n_tokens % t == 0:
            return t, False
    return cap, True                             # ragged tail: pad + slice


def sequence_embedding(ids, emb_table, *, block_tokens=1024):
    """ids: (B, S) integer token ids; emb_table: (V, D) float table."""
    B, S = ids.shape
    V, D = emb_table.shape
    N = B * S
    scale = math.sqrt(D)                         # sqrt(d_model)

    sub = _sublane_multiple(emb_table.dtype)
    T, _ = _choose_block_tokens(N, sub, block_tokens)
    n_blocks = -(-N // T)
    N_pad = n_blocks * T

    flat_ids = ids.reshape(N).astype(jnp.int32)
    if N_pad != N:
        flat_ids = jnp.pad(flat_ids, (0, N_pad - N))   # pad with token id 0
    ids_col = flat_ids.reshape(N_pad, 1)               # sublane-major delivery

    use_one_hot = V <= _ONE_HOT_MAX_VOCAB
    kernel = functools.partial(_embed_kernel, scale=scale, vocab_size=V,
                               use_one_hot=use_one_hot)

    itemsize = jnp.dtype(emb_table.dtype).itemsize
    try:
        vmem_cap = int(pltpu.get_tpu_info().vmem_capacity_bytes)
    except Exception:
        vmem_cap = 64 * 1024 * 1024                    # conservative fallback
    vmem_budget = int(vmem_cap * 0.8)                  # ~20% compiler headroom

    # TODO(synk): when V*D*itemsize exceeds vmem_budget the table cannot stay
    # VMEM-resident; add the HBM path (table BlockSpec(memory_space=pl.ANY),
    # scalar-prefetched ids, multi-outstanding pltpu.make_async_copy row DMAs
    # per (T, D) block). Needed earliest on v7x (64 MiB/TC).

    def _run(single_buffer_table):
        table_bufs = 1 if single_buffer_table else 2
        table_kwargs = {}
        if single_buffer_table:
            # Constant block index across the grid: one buffer suffices.
            table_kwargs["pipeline_mode"] = pl.Buffered(1)
        vmem_need = (table_bufs * V * D * itemsize     # resident table buffers
                     + 2 * T * D * itemsize            # double-buffered output
                     + 2 * T * 128 * 4                 # (T,1) ids, lane-padded
                     + (2 << 20))                      # scratch headroom
        vmem_limit = min(max(vmem_need, 32 * 1024 * 1024), vmem_budget)
        return pl.pallas_call(
            kernel,
            out_shape=jax.ShapeDtypeStruct((N_pad, D), emb_table.dtype),
            grid_spec=pltpu.PrefetchScalarGridSpec(
                num_scalar_prefetch=0,
                grid=(n_blocks,),
                in_specs=[
                    pl.BlockSpec((T, 1), lambda i: (i, 0)),  # ids for block i
                    pl.BlockSpec((V, D), lambda i: (0, 0),   # whole table, once
                                 **table_kwargs),
                ],
                out_specs=pl.BlockSpec((T, D), lambda i: (i, 0)),
            ),
            compiler_params=pltpu.CompilerParams(
                dimension_semantics=("parallel",),
                vmem_limit_bytes=vmem_limit,
            ),
        )(ids_col, emb_table)

    try:
        out = _run(single_buffer_table=True)
    except Exception:
        # Fallback if pl.Buffered(1) is rejected on this jax/libtpu version:
        # default double-buffered table (accounted for in vmem_need above).
        out = _run(single_buffer_table=False)

    if N_pad != N:
        out = out[:N]
    return out.reshape(B, S, D)


if __name__ == "__main__":
    vocab_size = 32
    d_model = 128
    batch, seq = 2, 8

    key = jax.random.PRNGKey(0)
    k_emb, k_ids = jax.random.split(key)

    # nn.Embedding default init: weights ~ N(0, 1)
    emb_table = jax.random.normal(k_emb, (vocab_size, d_model), dtype=jnp.float32)
    ids = jax.random.randint(k_ids, (batch, seq), 0, vocab_size, dtype=jnp.int32)

    out = jax.block_until_ready(sequence_embedding(ids, emb_table))

    # pure-JAX reference: gather + scale
    ref = emb_table[ids] * math.sqrt(d_model)
    assert out.shape == (batch, seq, d_model)
    assert out.dtype == jnp.float32
    assert jnp.allclose(out, ref, atol=1e-5, rtol=1e-5)

    print("KERNEL_OK")
</pallas_src>

<mosaic_0001>
module attributes {stable_mosaic.version = 11 : i64} {
  func.func @_embed_kernel(%arg0: i32, %arg1: memref<16x1xi32, #tpu.memory_space<vmem>>, %arg2: memref<32x128xf32, #tpu.memory_space<vmem>>, %arg3: memref<16x128xf32, #tpu.memory_space<vmem>>) attributes {dimension_semantics = [#tpu.dimension_semantics<parallel>], iteration_bounds = array<i64: 1>, scalar_prefetch = 0 : i64, scratch_operands = 0 : i64, tpu.core_type = #tpu.core_type<tc>, window_params = [{transform_indices = @transform_0, window_bounds = array<i64: 16, 1>}, {pipeline_mode = #tpu.pipeline_mode<synchronous>, transform_indices = @transform_1, window_bounds = array<i64: 32, 128>}, {transform_indices = @transform_2, window_bounds = array<i64: 16, 128>}]} {
    %c0 = arith.constant 0 : index
    %c0_0 = arith.constant 0 : index
    %0 = vector.load %arg1[%c0, %c0_0] : memref<16x1xi32, #tpu.memory_space<vmem>>, vector<16x1xi32>
    %1 = tpu.iota {dimensions = array<i32: 1>} : vector<16x32xi32>
    %2 = vector.broadcast %0 : vector<16x1xi32> to vector<16x32xi32>
    %3 = arith.cmpi eq, %2, %1 : vector<16x32xi32>
    %4 = arith.extui %3 : vector<16x32xi1> to vector<16x32xi32>
    %5 = arith.sitofp %4 : vector<16x32xi32> to vector<16x32xf32>
    %c0_1 = arith.constant 0 : index
    %c0_2 = arith.constant 0 : index
    %6 = vector.load %arg2[%c0_1, %c0_2] : memref<32x128xf32, #tpu.memory_space<vmem>>, vector<32x128xf32>
    %cst = arith.constant dense<0.000000e+00> : vector<16x128xf32>
    %7 = tpu.matmul %5, %6, %cst {dimension_numbers = #tpu.dot_dimension_numbers<[1], [0], [0], [1], [0, 0, 1, 1], [], []>} : vector<16x32xf32>, vector<32x128xf32>, vector<16x128xf32> -> vector<16x128xf32>
    %cst_3 = arith.constant 11.3137083 : f32
    %8 = vector.broadcast %cst_3 : f32 to vector<16x128xf32>
    %9 = arith.mulf %7, %8 : vector<16x128xf32>
    %c0_4 = arith.constant 0 : index
    %c0_5 = arith.constant 0 : index
    %10 = vector.load %arg3[%c0_4, %c0_5] : memref<16x128xf32, #tpu.memory_space<vmem>>, vector<16x128xf32>
    tpu.vector_store %arg3[%c0_4, %c0_5], %9 {strides = array<i32>} : memref<16x128xf32, #tpu.memory_space<vmem>>, vector<16x128xf32>,
    return
  }
  func.func @transform_0(%arg0: i32) -> (i32, i32) {
    %c0_i32 = arith.constant 0 : i32
    %c0_i32_0 = arith.constant 0 : i32
    return %arg0, %c0_i32 : i32, i32
  }
  func.func @transform_1(%arg0: i32) -> (i32, i32) {
    %c0_i32 = arith.constant 0 : i32
    %c0_i32_0 = arith.constant 0 : i32
    %c0_i32_1 = arith.constant 0 : i32
    return %c0_i32, %c0_i32_0 : i32, i32
  }
  func.func @transform_2(%arg0: i32) -> (i32, i32) {
    %c0_i32 = arith.constant 0 : i32
    %c0_i32_0 = arith.constant 0 : i32
    return %arg0, %c0_i32 : i32, i32
  }
}

module attributes {stable_mosaic.version = 11 : i64} {
  func.func @_embed_kernel(%arg0: i32, %arg1: memref<16x1xi32, #tpu.memory_space<vmem>>, %arg2: memref<32x128xf32, #tpu.memory_space<vmem>>, %arg3: memref<16x128xf32, #tpu.memory_space<vmem>>) attributes {dimension_semantics = [#tpu.dimension_semantics<parallel>], iteration_bounds = array<i64: 1>, scalar_prefetch = 0 : i64, scratch_operands = 0 : i64, tpu.core_type = #tpu.core_type<tc>, window_params = [{transform_indices = @transform_0, window_bounds = array<i64: 16, 1>}, {pipeline_mode = #tpu.pipeline_mode<synchronous>, transform_indices = @transform_1, window_bounds = array<i64: 32, 128>}, {transform_indices = @transform_2, window_bounds = array<i64: 16, 128>}]} {
    %c0 = arith.constant 0 : index
    %c0_0 = arith.constant 0 : index
    %0 = vector.load %arg1[%c0, %c0_0] : memref<16x1xi32, #tpu.memory_space<vmem>>, vector<16x1xi32>
    %1 = tpu.iota {dimensions = array<i32: 1>} : vector<16x32xi32>
    %2 = vector.broadcast %0 : vector<16x1xi32> to vector<16x32xi32>
    %3 = arith.cmpi eq, %2, %1 : vector<16x32xi32>
    %4 = arith.extui %3 : vector<16x32xi1> to vector<16x32xi32>
    %5 = arith.sitofp %4 : vector<16x32xi32> to vector<16x32xf32>
    %c0_1 = arith.constant 0 : index
    %c0_2 = arith.constant 0 : index
    %6 = vector.load %arg2[%c0_1, %c0_2] : memref<32x128xf32, #tpu.memory_space<vmem>>, vector<32x128xf32>
    %cst = arith.constant dense<0.000000e+00> : vector<16x128xf32>
    %7 = tpu.matmul %5, %6, %cst {dimension_numbers = #tpu.dot_dimension_numbers<[1], [0], [0], [1], [0, 0, 1, 1], [], []>} : vector<16x32xf32>, vector<32x128xf32>, vector<16x128xf32> -> vector<16x128xf32>
    %cst_3 = arith.constant 11.3137083 : f32
    %8 = vector.broadcast %cst_3 : f32 to vector<16x128xf32>
    %9 = arith.mulf %7, %8 : vector<16x128xf32>
    %c0_4 = arith.constant 0 : index
    %c0_5 = arith.constant 0 : index
    %10 = vector.load %arg3[%c0_4, %c0_5] : memref<16x128xf32, #tpu.memory_space<vmem>>, vector<16x128xf32>
    tpu.vector_store %arg3[%c0_4, %c0_5], %9 {strides = array<i32>} : memref<16x128xf32, #tpu.memory_space<vmem>>, vector<16x128xf32>,
    return
  }
  func.func @transform_0(%arg0: i32) -> (i32, i32) {
    %c0_i32 = arith.constant 0 : i32
    %c0_i32_0 = arith.constant 0 : i32
    return %arg0, %c0_i32 : i32, i32
  }
  func.func @transform_1(%arg0: i32) -> (i32, i32) {
    %c0_i32 = arith.constant 0 : i32
    %c0_i32_0 = arith.constant 0 : i32
    %c0_i32_1 = arith.constant 0 : i32
    return %c0_i32, %c0_i32_0 : i32, i32
  }
  func.func @transform_2(%arg0: i32) -> (i32, i32) {
    %c0_i32 = arith.constant 0 : i32
    %c0_i32_0 = arith.constant 0 : i32
    return %arg0, %c0_i32 : i32, i32
  }
}

</mosaic_0001>

<bundles_post_ra>
// kernel: tpu_custom_call.1
= control target key start
LH: loop header
LB: loop body
LE: loop exit
PB: predicated region body
PF: predicated region fallthrough
CT: control target
= control target key end

     0   :  { %7 = vsyncpa [#allocation3], 0  ;;  %s260_s0 = inlined_call_operand.vmem [shape: s32[16,1], index: 0, kind: input, shape index: {}]   ;;  %s261_s1 = inlined_call_operand.hbm [shape: f32[32,128], index: 1, kind: input, shape index: {}]   ;;  %s262_s2 = inlined_call_operand.hbm [shape: f32[16,128], index: 2, kind: output, shape index: {}]  }
   0x1   :  { %8 = vsyncpa [#allocation4], 0  ;;  %s221_s9 = smov [#allocation2]  }
   0x2   :  { %s16_s10 = sshll.u32 %s221_s9, 4  ;;  %s17_s10 = int_to_ptr.vmem [resolvable:$true] %s16_s10 }
   0x3   :  { %s185_s11 = scalar_lea.vmem %s17_s10, 512  ;;  %p190_p1 = scmp.lt.s32.totalorder %s17_s10, %s17_s10 }
   0x4   :  { %p186_p0 = scmp.ne.s32.totalorder %s17_s10, %s185_s11  ;;  %p191_p2 = scmp.lt.s32.totalorder %s185_s11, %s185_s11 }
   0x6   :  { %p192_p3 = por %p191_p2, %p190_p1 }
   0x8   :  { %p193_p4 = pnand %p192_p3, %p186_p0 }
   0xa   :  { %196 = shalt.err (!%p193_p4)
}
   0xb   :  { %s222_s12 = smov 128   ;;  %s223_s13 = smov 8  }
   0xc   :  { %22 = dma.hbm_to_vmem [thread:$0]  %s261_s1, 512, %s17_s10, [#allocation3], %s222_s12, %s222_s12, %s223_s13  }
   0xd   :  { %217 = dma.done.wait [#allocation3], 512  }
   0xe   :  { %218 = vsyncadd [#allocation3], 4294966784  ;;  %v224_v0 = vmov 0   ;;  %v26_v1 = vld [vmem:[%s260_s0] sm:$0xff]  ;;  %v45_v2 = vld [vmem:[#allocation2 + $0x18] sm:$0xff]  ;;  %v28_v7 = vlaneseq  ;;  %vm46_vm0 = vcmask 261120  }
   0xf   :  { %176 = vset.pattern.permute.xlu0 %v224_v0  ;;  %159 = vmatprep.subr.mxu0 %v45_v2  ;;  %v44_v3 = vld [vmem:[#allocation2 + $0x10] sm:$0xff]  ;;  %v27_v4 = vld [vmem:[%s260_s0 + $0x8] sm:$0xff]  ;;  %v42_v6 = vld [vmem:[#allocation2] sm:$0xff]  ;;  %v225_v10 = vmov 0.0   ;;  %s226_s0 = smov [#allocation5]  }
  0x10   :  { %31 = vperm.xlu0 %176, %v26_v1   ;;  %160 = vmatpush3.msra.mxu0 %v45_v2  ;;  %v43_v5 = vld [vmem:[#allocation2 + $0x8] sm:$0xff]  ;;  %v29_v8 = vand.u32 127, %v28_v7  ;;  %s137_s1 = sshll.u32 %s226_s0, 4  ;;  %s138_s1 = int_to_ptr.vmem [resolvable:$true] %s137_s1 }
  0x11   :  { %161 = vmatprep.subr.mxu0 %v44_v3  ;;  %s197_s20 = scalar_lea.vmem %s138_s1, 256  ;;  %p202_p6 = scmp.lt.s32.totalorder %s138_s1, %s138_s1 }
  0x12   :  { %162 = vmatpush3.msra.mxu0 %v44_v3  ;;  %p198_p5 = scmp.ne.s32.totalorder %s138_s1, %s197_s20  ;;  %p203_p7 = scmp.lt.s32.totalorder %s197_s20, %s197_s20 }
  0x13   :  { %163 = vmatprep.subr.mxu0 %v43_v5 }
  0x14   :  { %34 = vperm.xlu0 %176, %v27_v4   ;;  %164 = vmatpush3.msra.mxu0 %v43_v5  ;;  %p204_p8 = por %p203_p7, %p202_p6 }
  0x15   :  { %165 = vmatprep.subr.mxu0 %v42_v6 }
  0x16   :  { %166 = vmatpush3.msra.mxu0 %v42_v6  ;;  %p205_p9 = pnand %p204_p8, %p198_p5 }
  0x8b   :  { %v32_v9 = vpop.permute.xlu0 %31 }
  0x8c   :  { %vm36_vm1 = vcmp.eq.s32.totalorder %v32_v9, %v29_v8 }
  0x8d   :  { %v149_v11 = vsel %vm36_vm1, 1.0, %v225_v10 }
  0x8e   :  { %167 = vmatprep.mubr.msk.f32.mxu0 %vm46_vm0, %v149_v11 }
  0x8f   :  { %v35_v12 = vpop.permute.xlu0 %34 }
  0x90   :  { %vm37_vm2 = vcmp.eq.s32.totalorder %v35_v12, %v29_v8 }
  0x91   :  { %v150_v13 = vsel %vm37_vm2, 1.0, %v225_v10 }
  0x92   :  { %168 = vmatmul.mubr.msk.f32.vlgmr.msra.gmra.mxu0 %vm46_vm0, %v150_v13 }
 0x152   :  { %v169_v14 = vpop.f32.mrf.mxu0 }
 0x153   :  { %v129_v15 = vmul.f32 11.313708, %v169_v14 }
 0x154   :  { %v119_v16 = vpop.f32.mrf.mxu0 }
 0x155   :  { %131 = vst [vmem:[#allocation5 + $0x8] sm:$0xff] %v129_v15  ;;  %v128_v17 = vmul.f32 11.313708, %v119_v16 }
 0x157   :  { %130 = vst [vmem:[#allocation5] sm:$0xff] %v128_v17 }
 0x158   :  { %208 = shalt.err (!%p205_p9)
}
 0x159   :  { %143 = dma.vmem_to_hbm [thread:$0]  %s138_s1, 256, %s262_s2, [#allocation4], %s222_s12, %s222_s12, %s223_s13  }
 0x15a   :  { %219 = dma.done.wait [#allocation4], 256  }
 0x15b   :  { %220 = vsyncadd [#allocation4], 4294967040 }
 0x15c   :  { %147 = vsyncpa [#allocation3], 1 }
 0x15d   :  { %148 = vsyncpa [#allocation4], 1 }

// kernel: tpu_custom_call.1
= control target key start
LH: loop header
LB: loop body
LE: loop exit
PB: predicated region body
PF: predicated region fallthrough
CT: control target
= control target key end

     0   :  { %7 = vsyncpa [#allocation3], 0  ;;  %s260_s0 = inlined_call_operand.vmem [shape: s32[16,1], index: 0, kind: input, shape index: {}]   ;;  %s261_s1 = inlined_call_operand.hbm [shape: f32[32,128], index: 1, kind: input, shape index: {}]   ;;  %s262_s2 = inlined_call_operand.hbm [shape: f32[16,128], index: 2, kind: output, shape index: {}]  }
   0x1   :  { %8 = vsyncpa [#allocation4], 0  ;;  %s221_s9 = smov [#allocation2]  }
   0x2   :  { %s16_s10 = sshll.u32 %s221_s9, 4  ;;  %s17_s10 = int_to_ptr.vmem [resolvable:$true] %s16_s10 }
   0x3   :  { %s185_s11 = scalar_lea.vmem %s17_s10, 512  ;;  %p190_p1 = scmp.lt.s32.totalorder %s17_s10, %s17_s10 }
   0x4   :  { %p186_p0 = scmp.ne.s32.totalorder %s17_s10, %s185_s11  ;;  %p191_p2 = scmp.lt.s32.totalorder %s185_s11, %s185_s11 }
   0x6   :  { %p192_p3 = por %p191_p2, %p190_p1 }
   0x8   :  { %p193_p4 = pnand %p192_p3, %p186_p0 }
   0xa   :  { %196 = shalt.err (!%p193_p4)
}
   0xb   :  { %s222_s12 = smov 128   ;;  %s223_s13 = smov 8  }
   0xc   :  { %22 = dma.hbm_to_vmem [thread:$0]  %s261_s1, 512, %s17_s10, [#allocation3], %s222_s12, %s222_s12, %s223_s13  }
   0xd   :  { %217 = dma.done.wait [#allocation3], 512  }
   0xe   :  { %218 = vsyncadd [#allocation3], 4294966784  ;;  %v224_v0 = vmov 0   ;;  %v26_v1 = vld [vmem:[%s260_s0] sm:$0xff]  ;;  %v45_v2 = vld [vmem:[#allocation2 + $0x18] sm:$0xff]  ;;  %v28_v7 = vlaneseq  ;;  %vm46_vm0 = vcmask 261120  }
   0xf   :  { %176 = vset.pattern.permute.xlu0 %v224_v0  ;;  %159 = vmatprep.subr.mxu0 %v45_v2  ;;  %v44_v3 = vld [vmem:[#allocation2 + $0x10] sm:$0xff]  ;;  %v27_v4 = vld [vmem:[%s260_s0 + $0x8] sm:$0xff]  ;;  %v42_v6 = vld [vmem:[#allocation2] sm:$0xff]  ;;  %v225_v10 = vmov 0.0   ;;  %s226_s0 = smov [#allocation5]  }
  0x10   :  { %31 = vperm.xlu0 %176, %v26_v1   ;;  %160 = vmatpush3.msra.mxu0 %v45_v2  ;;  %v43_v5 = vld [vmem:[#allocation2 + $0x8] sm:$0xff]  ;;  %v29_v8 = vand.u32 127, %v28_v7  ;;  %s137_s1 = sshll.u32 %s226_s0, 4  ;;  %s138_s1 = int_to_ptr.vmem [resolvable:$true] %s137_s1 }
  0x11   :  { %161 = vmatprep.subr.mxu0 %v44_v3  ;;  %s197_s20 = scalar_lea.vmem %s138_s1, 256  ;;  %p202_p6 = scmp.lt.s32.totalorder %s138_s1, %s138_s1 }
  0x12   :  { %162 = vmatpush3.msra.mxu0 %v44_v3  ;;  %p198_p5 = scmp.ne.s32.totalorder %s138_s1, %s197_s20  ;;  %p203_p7 = scmp.lt.s32.totalorder %s197_s20, %s197_s20 }
  0x13   :  { %163 = vmatprep.subr.mxu0 %v43_v5 }
  0x14   :  { %34 = vperm.xlu0 %176, %v27_v4   ;;  %164 = vmatpush3.msra.mxu0 %v43_v5  ;;  %p204_p8 = por %p203_p7, %p202_p6 }
  0x15   :  { %165 = vmatprep.subr.mxu0 %v42_v6 }
  0x16   :  { %166 = vmatpush3.msra.mxu0 %v42_v6  ;;  %p205_p9 = pnand %p204_p8, %p198_p5 }
  0x8b   :  { %v32_v9 = vpop.permute.xlu0 %31 }
  0x8c   :  { %vm36_vm1 = vcmp.eq.s32.totalorder %v32_v9, %v29_v8 }
  0x8d   :  { %v149_v11 = vsel %vm36_vm1, 1.0, %v225_v10 }
  0x8e   :  { %167 = vmatprep.mubr.msk.f32.mxu0 %vm46_vm0, %v149_v11 }
  0x8f   :  { %v35_v12 = vpop.permute.xlu0 %34 }
  0x90   :  { %vm37_vm2 = vcmp.eq.s32.totalorder %v35_v12, %v29_v8 }
  0x91   :  { %v150_v13 = vsel %vm37_vm2, 1.0, %v225_v10 }
  0x92   :  { %168 = vmatmul.mubr.msk.f32.vlgmr.msra.gmra.mxu0 %vm46_vm0, %v150_v13 }
 0x152   :  { %v169_v14 = vpop.f32.mrf.mxu0 }
 0x153   :  { %v129_v15 = vmul.f32 11.313708, %v169_v14 }
 0x154   :  { %v119_v16 = vpop.f32.mrf.mxu0 }
 0x155   :  { %131 = vst [vmem:[#allocation5 + $0x8] sm:$0xff] %v129_v15  ;;  %v128_v17 = vmul.f32 11.313708, %v119_v16 }
 0x157   :  { %130 = vst [vmem:[#allocation5] sm:$0xff] %v128_v17 }
 0x158   :  { %208 = shalt.err (!%p205_p9)
}
 0x159   :  { %143 = dma.vmem_to_hbm [thread:$0]  %s138_s1, 256, %s262_s2, [#allocation4], %s222_s12, %s222_s12, %s223_s13  }
 0x15a   :  { %219 = dma.done.wait [#allocation4], 256  }
 0x15b   :  { %220 = vsyncadd [#allocation4], 4294967040 }
 0x15c   :  { %147 = vsyncpa [#allocation3], 1 }
 0x15d   :  { %148 = vsyncpa [#allocation4], 1 }

</bundles_post_ra>
